<compile_context>
chip_gen: v6e
topology: v6e:2x2x1
jax: 0.10.0
libtpu: 0.0.40
codegen_flags: <defaults>
</compile_context>

<pallas_src>
import functools

import numpy as np

import jax
import jax.numpy as jnp
from jax import lax
from jax.experimental import pallas as pl
from jax.experimental.pallas import tpu as pltpu


def _activate(y, activation):
    if activation == "relu":
        return jnp.maximum(y, 0.0)
    elif activation == "sigmoid":
        return jax.nn.sigmoid(y)
    return y


# ----------------------------- fused Pallas kernel -----------------------------

def _stream_kernel(x_ref, mask_ref, wsp_ref, wtp_ref, shs_ref, sht_ref, o_ref, *, H, W, acts):
    """All 3 ConvBlocks for `nb` batch elements, channel-major, VMEM/vreg-resident intermediates.

    x_ref:    (nb, CP, M)        input activations, M = T*H*W on lanes
    mask_ref: (12, CP, M)        0/1 boundary masks (9 spatial taps then 3 temporal taps)
    wsp_ref:  (3, CP, 9*CP)      stacked spatial weights per block (BN scale folded in)
    wtp_ref:  (3, CP, 3*CP)      stacked temporal weights per block (BN scale folded in)
    shs_ref:  (3, CP, 1)         spatial BN shift
    sht_ref:  (3, CP, 1)         temporal BN shift
    o_ref:    (nb, CP, M)
    """
    nb, CP, M = x_ref.shape
    HW = H * W
    nblk = wsp_ref.shape[0]

    def tap(v, d, midx):
        # value at output position m is v[m + d], zero outside the valid (t,h,w) window.
        r = v if d == 0 else pltpu.roll(v, shift=(-d) % M, axis=1)
        if d == 0:           # center tap: mask is all-ones
            return r
        return r * mask_ref[midx]

    for b in range(nb):
        a = x_ref[b]                                               # (CP, M)
        for blk in range(nblk):
            act = acts[blk]

            # ---- spatial (1,3,3) conv + folded BN + activation --------------------------
            taps = []
            for kh in range(3):
                for kw in range(3):
                    d = (kh - 1) * W + (kw - 1)
                    taps.append(tap(a, d, kh * 3 + kw))
            xs = jnp.concatenate(taps, axis=0)                     # (9*CP, M), sublane-aligned
            y = jnp.dot(wsp_ref[blk], xs,
                        preferred_element_type=jnp.float32) + shs_ref[blk]
            y = _activate(y, act)                                  # (CP, M)

            # ---- temporal (3,1,1) conv + folded BN + activation -------------------------
            taps = []
            for kt in range(3):
                d = (kt - 1) * HW
                taps.append(tap(y, d, 9 + kt))
            ys = jnp.concatenate(taps, axis=0)                     # (3*CP, M)
            z = jnp.dot(wtp_ref[blk], ys,
                        preferred_element_type=jnp.float32) + sht_ref[blk]
            a = _activate(z, act)                                  # (CP, M)

        o_ref[b] = a                                               # lane-dense store


# ----------------------------- helpers -----------------------------

def _round8(c):
    return ((c + 7) // 8) * 8


def _build_masks(T, H, W, CP):
    """(12, CP, M) float 0/1 masks: 9 spatial taps (kh, kw) then 3 temporal taps (kt)."""
    M = T * H * W
    m = np.arange(M)
    hq = (m // W) % H
    wq = m % W
    tq = m // (H * W)
    masks = []
    for kh in range(3):
        for kw in range(3):
            dh, dw = kh - 1, kw - 1
            valid = ((hq + dh >= 0) & (hq + dh < H) & (wq + dw >= 0) & (wq + dw < W))
            masks.append(valid)
    for kt in range(3):
        dt = kt - 1
        masks.append((tq + dt >= 0) & (tq + dt < T))
    mk = np.stack(masks, axis=0).astype(np.float32)                # (12, M)
    return jnp.asarray(np.repeat(mk[:, None, :], CP, axis=1))      # (12, CP, M)


def _num_tensorcores_per_chip():
    """Best-effort TC-per-chip detection. Perf-only; both code paths are correct."""
    try:
        kind = jax.devices()[0].device_kind.lower()
    except Exception:
        return 2
    single_tc = ("v5 lite" in kind or "v5e" in kind or "v6 lite" in kind or "v6e" in kind
                 or "v2" in kind or "v3" in kind)
    return 1 if single_tc else 2


def _prep_weights(params, CP):
    """Fold BN scale into conv weights, pad channels to CP, stack taps into K, stack blocks."""
    wsp_l, wtp_l, shs_l, sht_l = [], [], [], []
    for p in params:
        ws = p["ws"] * p["scale_s"][0]                              # (3, 3, cin, cout)
        wt = p["wt"] * p["scale_t"][0]                              # (3, cint, cout)
        _, _, cin, cout = ws.shape
        _, cint, cout_t = wt.shape
        ws = jnp.pad(ws, ((0, 0), (0, 0), (0, CP - cin), (0, CP - cout)))
        wt = jnp.pad(wt, ((0, 0), (0, CP - cint), (0, CP - cout_t)))
        # spatial: Wsp[o, (kh*3+kw)*CP + c] = ws[kh, kw, c, o]
        wsp = jnp.transpose(ws, (3, 0, 1, 2)).reshape(CP, 9 * CP)
        # temporal: Wtp[o, kt*CP + c] = wt[kt, c, o]
        wtp = jnp.transpose(wt, (2, 0, 1)).reshape(CP, 3 * CP)
        shs = jnp.pad(p["shift_s"][0], (0, CP - cout)).reshape(CP, 1)
        sht = jnp.pad(p["shift_t"][0], (0, CP - cout_t)).reshape(CP, 1)
        wsp_l.append(wsp); wtp_l.append(wtp); shs_l.append(shs); sht_l.append(sht)
    return (jnp.stack(wsp_l), jnp.stack(wtp_l), jnp.stack(shs_l), jnp.stack(sht_l))


# ----------------------------- module wrapper -----------------------------

def stream_block_forward(x, params, final_activation="relu"):
    """StreamBlock forward. x: (B, C, T, H, W) -> (B, Cout, T, H, W)."""
    B, C0, T, H, W = x.shape
    C_out = params[2]["ws"].shape[-1]
    M = T * H * W
    acts = ("relu", "relu", final_activation)

    # Common padded channel width (all intermediate channel counts padded to this).
    CP = max(_round8(c) for c in
             [C0] + [p["ws"].shape[-1] for p in params] + [p["wt"].shape[-1] for p in params])

    wsp_all, wtp_all, shs_all, sht_all = _prep_weights(params, CP)
    masks = _build_masks(T, H, W, CP)

    # NCDHW is already channel-major over M -> free reshape; pad channels 4 -> CP with zeros.
    x_cm = x.reshape(B, C0, M)
    if C0 < CP:
        x_cm = jnp.pad(x_cm, ((0, 0), (0, CP - C0), (0, 0)))

    # Batch in the grid on multi-TC chips (megacore sharding); folded into one step on single-TC.
    fold_batch = (_num_tensorcores_per_chip() == 1) and (B * CP * M * 4 <= (4 << 20))
    nb = B if fold_batch else 1
    grid = (B // nb,)

    in_specs = [
        pl.BlockSpec((nb, CP, M), lambda b: (b, 0, 0)),
        pl.BlockSpec(masks.shape, lambda b: (0, 0, 0)),
        pl.BlockSpec(wsp_all.shape, lambda b: (0, 0, 0)),
        pl.BlockSpec(wtp_all.shape, lambda b: (0, 0, 0)),
        pl.BlockSpec(shs_all.shape, lambda b: (0, 0, 0)),
        pl.BlockSpec(sht_all.shape, lambda b: (0, 0, 0)),
    ]
    out_specs = pl.BlockSpec((nb, CP, M), lambda b: (b, 0, 0))

    # Advisory cost estimate so XLA schedules the (tiny) surrounding reshapes well.
    flops = 3 * (2 * B * M * 9 * CP * CP + 2 * B * M * 3 * CP * CP)
    transcendentals = B * M * CP if final_activation == "sigmoid" else 0
    bytes_accessed = 4 * int(x_cm.size + masks.size + B * CP * M
                             + wsp_all.size + wtp_all.size + shs_all.size + sht_all.size)

    kern = functools.partial(_stream_kernel, H=H, W=W, acts=acts)
    out = pl.pallas_call(
        kern,
        out_shape=jax.ShapeDtypeStruct((B, CP, M), jnp.float32),
        grid=grid,
        in_specs=in_specs,
        out_specs=out_specs,
        compiler_params=pltpu.CompilerParams(dimension_semantics=("parallel",)),
        cost_estimate=pl.CostEstimate(flops=flops,
                                      transcendentals=transcendentals,
                                      bytes_accessed=bytes_accessed),
    )(x_cm, masks, wsp_all, wtp_all, shs_all, sht_all)

    # Drop padded channels; reshape back to NCDHW (free, channel-major already).
    return out[:, :C_out, :].reshape(B, C_out, T, H, W)


# ----------------------------- parameter init -----------------------------

def _init_bn_fold(key, c):
    k1, k2, k3, k4 = jax.random.split(key, 4)
    gamma = 1.0 + 0.1 * jax.random.normal(k1, (c,), jnp.float32)
    beta = 0.1 * jax.random.normal(k2, (c,), jnp.float32)
    mean = 0.1 * jax.random.normal(k3, (c,), jnp.float32)
    var = jax.random.uniform(k4, (c,), jnp.float32, minval=0.5, maxval=1.5)
    scale = gamma / jnp.sqrt(var + 1e-5)
    shift = beta - mean * scale
    return scale.reshape(1, c), shift.reshape(1, c)


def init_conv_block_params(key, cin, cout):
    k0, k1, k2, k3 = jax.random.split(key, 4)
    ws = jax.random.normal(k0, (3, 3, cin, cout), jnp.float32) / jnp.sqrt(9.0 * cin)
    wt = jax.random.normal(k1, (3, cout, cout), jnp.float32) / jnp.sqrt(3.0 * cout)
    scale_s, shift_s = _init_bn_fold(k2, cout)
    scale_t, shift_t = _init_bn_fold(k3, cout)
    return dict(ws=ws, wt=wt, scale_s=scale_s, shift_s=shift_s,
                scale_t=scale_t, shift_t=shift_t)


def init_stream_params(key, channels):
    in_ch, mid_ch, out_ch = channels
    k1, k2, k3 = jax.random.split(key, 3)
    return [init_conv_block_params(k1, in_ch, mid_ch),
            init_conv_block_params(k2, mid_ch, mid_ch),
            init_conv_block_params(k3, mid_ch, out_ch)]


# ----------------------------- pure-JAX reference -----------------------------

def _ref_conv_block(x, p, activation):
    ws = jnp.transpose(p["ws"], (3, 2, 0, 1))[:, :, None, :, :]          # (O,I,1,3,3)
    y = lax.conv_general_dilated(x, ws, (1, 1, 1), [(0, 0), (1, 1), (1, 1)],
                                 dimension_numbers=("NCDHW", "OIDHW", "NCDHW"),
                                 precision=lax.Precision.HIGHEST)
    y = y * p["scale_s"][0][None, :, None, None, None] + p["shift_s"][0][None, :, None, None, None]
    y = _activate(y, activation)
    wt = jnp.transpose(p["wt"], (2, 1, 0))[:, :, :, None, None]          # (O,I,3,1,1)
    y = lax.conv_general_dilated(y, wt, (1, 1, 1), [(1, 1), (0, 0), (0, 0)],
                                 dimension_numbers=("NCDHW", "OIDHW", "NCDHW"),
                                 precision=lax.Precision.HIGHEST)
    y = y * p["scale_t"][0][None, :, None, None, None] + p["shift_t"][0][None, :, None, None, None]
    y = _activate(y, activation)
    return y


def ref_stream_block(x, params, final_activation="relu"):
    x = _ref_conv_block(x, params[0], "relu")
    x = _ref_conv_block(x, params[1], "relu")
    x = _ref_conv_block(x, params[2], final_activation)
    return x


# ----------------------------- main -----------------------------

if __name__ == "__main__":
    key = jax.random.PRNGKey(0)
    kp, kx = jax.random.split(key)

    B, T, H, W = 2, 4, 8, 8
    channels = (4, 8, 8)  # (in_ch, mid_ch, out_ch)

    params = init_stream_params(kp, channels)
    x = jax.random.normal(kx, (B, channels[0], T, H, W), jnp.float32)

    fwd = jax.jit(functools.partial(stream_block_forward, final_activation="relu"))
    out = jax.block_until_ready(fwd(x, params))

    ref = jax.block_until_ready(ref_stream_block(x, params, "relu"))
    assert out.shape == ref.shape == (B, channels[2], T, H, W), (out.shape, ref.shape)
    max_err = float(jnp.max(jnp.abs(out - ref)))
    assert max_err < 1e-3, f"mismatch vs reference: {max_err}"

    print("KERNEL_OK")
</pallas_src>

<mosaic_0001>
module attributes {stable_mosaic.version = 11 : i64} {
  func.func @_stream_kernel(%arg0: i32, %arg1: memref<1x8x256xf32, #tpu.memory_space<vmem>>, %arg2: memref<12x8x256xf32, #tpu.memory_space<vmem>>, %arg3: memref<3x8x72xf32, #tpu.memory_space<vmem>>, %arg4: memref<3x8x24xf32, #tpu.memory_space<vmem>>, %arg5: memref<3x8x1xf32, #tpu.memory_space<vmem>>, %arg6: memref<3x8x1xf32, #tpu.memory_space<vmem>>, %arg7: memref<1x8x256xf32, #tpu.memory_space<vmem>>) attributes {dimension_semantics = [#tpu.dimension_semantics<parallel>], iteration_bounds = array<i64: 2>, scalar_prefetch = 0 : i64, scratch_operands = 0 : i64, tpu.core_type = #tpu.core_type<tc>, window_params = [{transform_indices = @transform_0, window_bounds = array<i64: 1, 8, 256>}, {pipeline_mode = #tpu.pipeline_mode<synchronous>, transform_indices = @transform_1, window_bounds = array<i64: 12, 8, 256>}, {pipeline_mode = #tpu.pipeline_mode<synchronous>, transform_indices = @transform_2, window_bounds = array<i64: 3, 8, 72>}, {pipeline_mode = #tpu.pipeline_mode<synchronous>, transform_indices = @transform_3, window_bounds = array<i64: 3, 8, 24>}, {pipeline_mode = #tpu.pipeline_mode<synchronous>, transform_indices = @transform_4, window_bounds = array<i64: 3, 8, 1>}, {pipeline_mode = #tpu.pipeline_mode<synchronous>, transform_indices = @transform_5, window_bounds = array<i64: 3, 8, 1>}, {transform_indices = @transform_6, window_bounds = array<i64: 1, 8, 256>}]} {
    %c0 = arith.constant 0 : index
    %c0_0 = arith.constant 0 : index
    %c0_1 = arith.constant 0 : index
    %0 = vector.load %arg1[%c0, %c0_0, %c0_1] : memref<1x8x256xf32, #tpu.memory_space<vmem>>, vector<1x8x256xf32>
    %1 = vector.shape_cast %0 : vector<1x8x256xf32> to vector<8x256xf32>
    %c9_i32 = arith.constant 9 : i32
    %2 = tpu.dynamic_rotate %1 by %c9_i32 dim 1 : vector<8x256xf32>, i32 -> vector<8x256xf32>
    %c0_2 = arith.constant 0 : index
    %c0_3 = arith.constant 0 : index
    %c0_4 = arith.constant 0 : index
    %3 = vector.load %arg2[%c0_2, %c0_3, %c0_4] : memref<12x8x256xf32, #tpu.memory_space<vmem>>, vector<1x8x256xf32>
    %4 = vector.shape_cast %3 : vector<1x8x256xf32> to vector<8x256xf32>
    %5 = arith.mulf %2, %4 : vector<8x256xf32>
    %c8_i32 = arith.constant 8 : i32
    %6 = tpu.dynamic_rotate %1 by %c8_i32 dim 1 : vector<8x256xf32>, i32 -> vector<8x256xf32>
    %c1 = arith.constant 1 : index
    %c0_5 = arith.constant 0 : index
    %c0_6 = arith.constant 0 : index
    %7 = vector.load %arg2[%c1, %c0_5, %c0_6] : memref<12x8x256xf32, #tpu.memory_space<vmem>>, vector<1x8x256xf32>
    %8 = vector.shape_cast %7 : vector<1x8x256xf32> to vector<8x256xf32>
    %9 = arith.mulf %6, %8 : vector<8x256xf32>
    %c7_i32 = arith.constant 7 : i32
    %10 = tpu.dynamic_rotate %1 by %c7_i32 dim 1 : vector<8x256xf32>, i32 -> vector<8x256xf32>
    %c2 = arith.constant 2 : index
    %c0_7 = arith.constant 0 : index
    %c0_8 = arith.constant 0 : index
    %11 = vector.load %arg2[%c2, %c0_7, %c0_8] : memref<12x8x256xf32, #tpu.memory_space<vmem>>, vector<1x8x256xf32>
    %12 = vector.shape_cast %11 : vector<1x8x256xf32> to vector<8x256xf32>
    %13 = arith.mulf %10, %12 : vector<8x256xf32>
    %c1_i32 = arith.constant 1 : i32
    %14 = tpu.dynamic_rotate %1 by %c1_i32 dim 1 : vector<8x256xf32>, i32 -> vector<8x256xf32>
    %c3 = arith.constant 3 : index
    %c0_9 = arith.constant 0 : index
    %c0_10 = arith.constant 0 : index
    %15 = vector.load %arg2[%c3, %c0_9, %c0_10] : memref<12x8x256xf32, #tpu.memory_space<vmem>>, vector<1x8x256xf32>
    %16 = vector.shape_cast %15 : vector<1x8x256xf32> to vector<8x256xf32>
    %17 = arith.mulf %14, %16 : vector<8x256xf32>
    %c255_i32 = arith.constant 255 : i32
    %18 = tpu.dynamic_rotate %1 by %c255_i32 dim 1 : vector<8x256xf32>, i32 -> vector<8x256xf32>
    %c5 = arith.constant 5 : index
    %c0_11 = arith.constant 0 : index
    %c0_12 = arith.constant 0 : index
    %19 = vector.load %arg2[%c5, %c0_11, %c0_12] : memref<12x8x256xf32, #tpu.memory_space<vmem>>, vector<1x8x256xf32>
    %20 = vector.shape_cast %19 : vector<1x8x256xf32> to vector<8x256xf32>
    %21 = arith.mulf %18, %20 : vector<8x256xf32>
    %c249_i32 = arith.constant 249 : i32
    %22 = tpu.dynamic_rotate %1 by %c249_i32 dim 1 : vector<8x256xf32>, i32 -> vector<8x256xf32>
    %c6 = arith.constant 6 : index
    %c0_13 = arith.constant 0 : index
    %c0_14 = arith.constant 0 : index
    %23 = vector.load %arg2[%c6, %c0_13, %c0_14] : memref<12x8x256xf32, #tpu.memory_space<vmem>>, vector<1x8x256xf32>
    %24 = vector.shape_cast %23 : vector<1x8x256xf32> to vector<8x256xf32>
    %25 = arith.mulf %22, %24 : vector<8x256xf32>
    %c248_i32 = arith.constant 248 : i32
    %26 = tpu.dynamic_rotate %1 by %c248_i32 dim 1 : vector<8x256xf32>, i32 -> vector<8x256xf32>
    %c7 = arith.constant 7 : index
    %c0_15 = arith.constant 0 : index
    %c0_16 = arith.constant 0 : index
    %27 = vector.load %arg2[%c7, %c0_15, %c0_16] : memref<12x8x256xf32, #tpu.memory_space<vmem>>, vector<1x8x256xf32>
    %28 = vector.shape_cast %27 : vector<1x8x256xf32> to vector<8x256xf32>
    %29 = arith.mulf %26, %28 : vector<8x256xf32>
    %c247_i32 = arith.constant 247 : i32
    %30 = tpu.dynamic_rotate %1 by %c247_i32 dim 1 : vector<8x256xf32>, i32 -> vector<8x256xf32>
    %c8 = arith.constant 8 : index
    %c0_17 = arith.constant 0 : index
    %c0_18 = arith.constant 0 : index
    %31 = vector.load %arg2[%c8, %c0_17, %c0_18] : memref<12x8x256xf32, #tpu.memory_space<vmem>>, vector<1x8x256xf32>
    %32 = vector.shape_cast %31 : vector<1x8x256xf32> to vector<8x256xf32>
    %33 = arith.mulf %30, %32 : vector<8x256xf32>
    %34 = tpu.concatenate %5, %9, %13, %17, %1, %21, %25, %29, %33 in 0 : vector<8x256xf32>, vector<8x256xf32>, vector<8x256xf32>, vector<8x256xf32>, vector<8x256xf32>, vector<8x256xf32>, vector<8x256xf32>, vector<8x256xf32>, vector<8x256xf32> -> vector<72x256xf32>
    %c0_19 = arith.constant 0 : index
    %c0_20 = arith.constant 0 : index
    %c0_21 = arith.constant 0 : index
    %35 = vector.load %arg3[%c0_19, %c0_20, %c0_21] : memref<3x8x72xf32, #tpu.memory_space<vmem>>, vector<1x8x72xf32>
    %36 = vector.shape_cast %35 : vector<1x8x72xf32> to vector<8x72xf32>
    %cst = arith.constant dense<0.000000e+00> : vector<8x256xf32>
    %37 = tpu.matmul %36, %34, %cst {dimension_numbers = #tpu.dot_dimension_numbers<[1], [0], [0], [1], [0, 0, 1, 1], [], []>} : vector<8x72xf32>, vector<72x256xf32>, vector<8x256xf32> -> vector<8x256xf32>
    %c0_22 = arith.constant 0 : index
    %c0_23 = arith.constant 0 : index
    %c0_24 = arith.constant 0 : index
    %38 = vector.load %arg5[%c0_22, %c0_23, %c0_24] : memref<3x8x1xf32, #tpu.memory_space<vmem>>, vector<1x8x1xf32>
    %39 = vector.shape_cast %38 : vector<1x8x1xf32> to vector<8x1xf32>
    %40 = vector.broadcast %39 : vector<8x1xf32> to vector<8x256xf32>
    %41 = arith.addf %37, %40 : vector<8x256xf32>
    %cst_25 = arith.constant 0.000000e+00 : f32
    %42 = vector.broadcast %cst_25 : f32 to vector<8x256xf32>
    %43 = arith.maximumf %41, %42 : vector<8x256xf32>
    %c64_i32 = arith.constant 64 : i32
    %44 = tpu.dynamic_rotate %43 by %c64_i32 dim 1 : vector<8x256xf32>, i32 -> vector<8x256xf32>
    %c9 = arith.constant 9 : index
    %c0_26 = arith.constant 0 : index
    %c0_27 = arith.constant 0 : index
    %45 = vector.load %arg2[%c9, %c0_26, %c0_27] : memref<12x8x256xf32, #tpu.memory_space<vmem>>, vector<1x8x256xf32>
    %46 = vector.shape_cast %45 : vector<1x8x256xf32> to vector<8x256xf32>
    %47 = arith.mulf %44, %46 : vector<8x256xf32>
    %c192_i32 = arith.constant 192 : i32
    %48 = tpu.dynamic_rotate %43 by %c192_i32 dim 1 : vector<8x256xf32>, i32 -> vector<8x256xf32>
    %c11 = arith.constant 11 : index
    %c0_28 = arith.constant 0 : index
    %c0_29 = arith.constant 0 : index
    %49 = vector.load %arg2[%c11, %c0_28, %c0_29] : memref<12x8x256xf32, #tpu.memory_space<vmem>>, vector<1x8x256xf32>
    %50 = vector.shape_cast %49 : vector<1x8x256xf32> to vector<8x256xf32>
    %51 = arith.mulf %48, %50 : vector<8x256xf32>
    %52 = tpu.concatenate %47, %43, %51 in 0 : vector<8x256xf32>, vector<8x256xf32>, vector<8x256xf32> -> vector<24x256xf32>
    %c0_30 = arith.constant 0 : index
    %c0_31 = arith.constant 0 : index
    %c0_32 = arith.constant 0 : index
    %53 = vector.load %arg4[%c0_30, %c0_31, %c0_32] : memref<3x8x24xf32, #tpu.memory_space<vmem>>, vector<1x8x24xf32>
    %54 = vector.shape_cast %53 : vector<1x8x24xf32> to vector<8x24xf32>
    %cst_33 = arith.constant dense<0.000000e+00> : vector<8x256xf32>
    %55 = tpu.matmul %54, %52, %cst_33 {dimension_numbers = #tpu.dot_dimension_numbers<[1], [0], [0], [1], [0, 0, 1, 1], [], []>} : vector<8x24xf32>, vector<24x256xf32>, vector<8x256xf32> -> vector<8x256xf32>
    %c0_34 = arith.constant 0 : index
    %c0_35 = arith.constant 0 : index
    %c0_36 = arith.constant 0 : index
    %56 = vector.load %arg6[%c0_34, %c0_35, %c0_36] : memref<3x8x1xf32, #tpu.memory_space<vmem>>, vector<1x8x1xf32>
    %57 = vector.shape_cast %56 : vector<1x8x1xf32> to vector<8x1xf32>
    %58 = vector.broadcast %57 : vector<8x1xf32> to vector<8x256xf32>
    %59 = arith.addf %55, %58 : vector<8x256xf32>
    %cst_37 = arith.constant 0.000000e+00 : f32
    %60 = vector.broadcast %cst_37 : f32 to vector<8x256xf32>
    %61 = arith.maximumf %59, %60 : vector<8x256xf32>
    %c9_i32_38 = arith.constant 9 : i32
    %62 = tpu.dynamic_rotate %61 by %c9_i32_38 dim 1 : vector<8x256xf32>, i32 -> vector<8x256xf32>
    %c0_39 = arith.constant 0 : index
    %c0_40 = arith.constant 0 : index
    %c0_41 = arith.constant 0 : index
    %63 = vector.load %arg2[%c0_39, %c0_40, %c0_41] : memref<12x8x256xf32, #tpu.memory_space<vmem>>, vector<1x8x256xf32>
    %64 = vector.shape_cast %63 : vector<1x8x256xf32> to vector<8x256xf32>
    %65 = arith.mulf %62, %64 : vector<8x256xf32>
    %c8_i32_42 = arith.constant 8 : i32
    %66 = tpu.dynamic_rotate %61 by %c8_i32_42 dim 1 : vector<8x256xf32>, i32 -> vector<8x256xf32>
    %c1_43 = arith.constant 1 : index
    %c0_44 = arith.constant 0 : index
    %c0_45 = arith.constant 0 : index
    %67 = vector.load %arg2[%c1_43, %c0_44, %c0_45] : memref<12x8x256xf32, #tpu.memory_space<vmem>>, vector<1x8x256xf32>
    %68 = vector.shape_cast %67 : vector<1x8x256xf32> to vector<8x256xf32>
    %69 = arith.mulf %66, %68 : vector<8x256xf32>
    %c7_i32_46 = arith.constant 7 : i32
    %70 = tpu.dynamic_rotate %61 by %c7_i32_46 dim 1 : vector<8x256xf32>, i32 -> vector<8x256xf32>
    %c2_47 = arith.constant 2 : index
    %c0_48 = arith.constant 0 : index
    %c0_49 = arith.constant 0 : index
    %71 = vector.load %arg2[%c2_47, %c0_48, %c0_49] : memref<12x8x256xf32, #tpu.memory_space<vmem>>, vector<1x8x256xf32>
    %72 = vector.shape_cast %71 : vector<1x8x256xf32> to vector<8x256xf32>
    %73 = arith.mulf %70, %72 : vector<8x256xf32>
    %c1_i32_50 = arith.constant 1 : i32
    %74 = tpu.dynamic_rotate %61 by %c1_i32_50 dim 1 : vector<8x256xf32>, i32 -> vector<8x256xf32>
    %c3_51 = arith.constant 3 : index
    %c0_52 = arith.constant 0 : index
    %c0_53 = arith.constant 0 : index
    %75 = vector.load %arg2[%c3_51, %c0_52, %c0_53] : memref<12x8x256xf32, #tpu.memory_space<vmem>>, vector<1x8x256xf32>
    %76 = vector.shape_cast %75 : vector<1x8x256xf32> to vector<8x256xf32>
    %77 = arith.mulf %74, %76 : vector<8x256xf32>
    %c255_i32_54 = arith.constant 255 : i32
    %78 = tpu.dynamic_rotate %61 by %c255_i32_54 dim 1 : vector<8x256xf32>, i32 -> vector<8x256xf32>
    %c5_55 = arith.constant 5 : index
    %c0_56 = arith.constant 0 : index
    %c0_57 = arith.constant 0 : index
    %79 = vector.load %arg2[%c5_55, %c0_56, %c0_57] : memref<12x8x256xf32, #tpu.memory_space<vmem>>, vector<1x8x256xf32>
    %80 = vector.shape_cast %79 : vector<1x8x256xf32> to vector<8x256xf32>
    %81 = arith.mulf %78, %80 : vector<8x256xf32>
    %c249_i32_58 = arith.constant 249 : i32
    %82 = tpu.dynamic_rotate %61 by %c249_i32_58 dim 1 : vector<8x256xf32>, i32 -> vector<8x256xf32>
    %c6_59 = arith.constant 6 : index
    %c0_60 = arith.constant 0 : index
    %c0_61 = arith.constant 0 : index
    %83 = vector.load %arg2[%c6_59, %c0_60, %c0_61] : memref<12x8x256xf32, #tpu.memory_space<vmem>>, vector<1x8x256xf32>
    %84 = vector.shape_cast %83 : vector<1x8x256xf32> to vector<8x256xf32>
    %85 = arith.mulf %82, %84 : vector<8x256xf32>
    %c248_i32_62 = arith.constant 248 : i32
    %86 = tpu.dynamic_rotate %61 by %c248_i32_62 dim 1 : vector<8x256xf32>, i32 -> vector<8x256xf32>
    %c7_63 = arith.constant 7 : index
    %c0_64 = arith.constant 0 : index
    %c0_65 = arith.constant 0 : index
    %87 = vector.load %arg2[%c7_63, %c0_64, %c0_65] : memref<12x8x256xf32, #tpu.memory_space<vmem>>, vector<1x8x256xf32>
    %88 = vector.shape_cast %87 : vector<1x8x256xf32> to vector<8x256xf32>
    %89 = arith.mulf %86, %88 : vector<8x256xf32>
    %c247_i32_66 = arith.constant 247 : i32
    %90 = tpu.dynamic_rotate %61 by %c247_i32_66 dim 1 : vector<8x256xf32>, i32 -> vector<8x256xf32>
    %c8_67 = arith.constant 8 : index
    %c0_68 = arith.constant 0 : index
    %c0_69 = arith.constant 0 : index
    %91 = vector.load %arg2[%c8_67, %c0_68, %c0_69] : memref<12x8x256xf32, #tpu.memory_space<vmem>>, vector<1x8x256xf32>
    %92 = vector.shape_cast %91 : vector<1x8x256xf32> to vector<8x256xf32>
    %93 = arith.mulf %90, %92 : vector<8x256xf32>
    %94 = tpu.concatenate %65, %69, %73, %77, %61, %81, %85, %89, %93 in 0 : vector<8x256xf32>, vector<8x256xf32>, vector<8x256xf32>, vector<8x256xf32>, vector<8x256xf32>, vector<8x256xf32>, vector<8x256xf32>, vector<8x256xf32>, vector<8x256xf32> -> vector<72x256xf32>
    %c1_70 = arith.constant 1 : index
    %c0_71 = arith.constant 0 : index
    %c0_72 = arith.constant 0 : index
    %95 = vector.load %arg3[%c1_70, %c0_71, %c0_72] : memref<3x8x72xf32, #tpu.memory_space<vmem>>, vector<1x8x72xf32>
    %96 = vector.shape_cast %95 : vector<1x8x72xf32> to vector<8x72xf32>
    %cst_73 = arith.constant dense<0.000000e+00> : vector<8x256xf32>
    %97 = tpu.matmul %96, %94, %cst_73 {dimension_numbers = #tpu.dot_dimension_numbers<[1], [0], [0], [1], [0, 0, 1, 1], [], []>} : vector<8x72xf32>, vector<72x256xf32>, vector<8x256xf32> -> vector<8x256xf32>
    %c1_74 = arith.constant 1 : index
    %c0_75 = arith.constant 0 : index
    %c0_76 = arith.constant 0 : index
    %98 = vector.load %arg5[%c1_74, %c0_75, %c0_76] : memref<3x8x1xf32, #tpu.memory_space<vmem>>, vector<1x8x1xf32>
    %99 = vector.shape_cast %98 : vector<1x8x1xf32> to vector<8x1xf32>
    %100 = vector.broadcast %99 : vector<8x1xf32> to vector<8x256xf32>
    %101 = arith.addf %97, %100 : vector<8x256xf32>
    %cst_77 = arith.constant 0.000000e+00 : f32
    %102 = vector.broadcast %cst_77 : f32 to vector<8x256xf32>
    %103 = arith.maximumf %101, %102 : vector<8x256xf32>
    %c64_i32_78 = arith.constant 64 : i32
    %104 = tpu.dynamic_rotate %103 by %c64_i32_78 dim 1 : vector<8x256xf32>, i32 -> vector<8x256xf32>
    %c9_79 = arith.constant 9 : index
    %c0_80 = arith.constant 0 : index
    %c0_81 = arith.constant 0 : index
    %105 = vector.load %arg2[%c9_79, %c0_80, %c0_81] : memref<12x8x256xf32, #tpu.memory_space<vmem>>, vector<1x8x256xf32>
    %106 = vector.shape_cast %105 : vector<1x8x256xf32> to vector<8x256xf32>
    %107 = arith.mulf %104, %106 : vector<8x256xf32>
    %c192_i32_82 = arith.constant 192 : i32
    %108 = tpu.dynamic_rotate %103 by %c192_i32_82 dim 1 : vector<8x256xf32>, i32 -> vector<8x256xf32>
    %c11_83 = arith.constant 11 : index
    %c0_84 = arith.constant 0 : index
    %c0_85 = arith.constant 0 : index
    %109 = vector.load %arg2[%c11_83, %c0_84, %c0_85] : memref<12x8x256xf32, #tpu.memory_space<vmem>>, vector<1x8x256xf32>
    %110 = vector.shape_cast %109 : vector<1x8x256xf32> to vector<8x256xf32>
    %111 = arith.mulf %108, %110 : vector<8x256xf32>
    %112 = tpu.concatenate %107, %103, %111 in 0 : vector<8x256xf32>, vector<8x256xf32>, vector<8x256xf32> -> vector<24x256xf32>
    %c1_86 = arith.constant 1 : index
    %c0_87 = arith.constant 0 : index
    %c0_88 = arith.constant 0 : index
    %113 = vector.load %arg4[%c1_86, %c0_87, %c0_88] : memref<3x8x24xf32, #tpu.memory_space<vmem>>, vector<1x8x24xf32>
    %114 = vector.shape_cast %113 : vector<1x8x24xf32> to vector<8x24xf32>
    %cst_89 = arith.constant dense<0.000000e+00> : vector<8x256xf32>
    %115 = tpu.matmul %114, %112, %cst_89 {dimension_numbers = #tpu.dot_dimension_numbers<[1], [0], [0], [1], [0, 0, 1, 1], [], []>} : vector<8x24xf32>, vector<24x256xf32>, vector<8x256xf32> -> vector<8x256xf32>
    %c1_90 = arith.constant 1 : index
    %c0_91 = arith.constant 0 : index
    %c0_92 = arith.constant 0 : index
    %116 = vector.load %arg6[%c1_90, %c0_91, %c0_92] : memref<3x8x1xf32, #tpu.memory_space<vmem>>, vector<1x8x1xf32>
    %117 = vector.shape_cast %116 : vector<1x8x1xf32> to vector<8x1xf32>
    %118 = vector.broadcast %117 : vector<8x1xf32> to vector<8x256xf32>
    %119 = arith.addf %115, %118 : vector<8x256xf32>
    %cst_93 = arith.constant 0.000000e+00 : f32
    %120 = vector.broadcast %cst_93 : f32 to vector<8x256xf32>
    %121 = arith.maximumf %119, %120 : vector<8x256xf32>
    %c9_i32_94 = arith.constant 9 : i32
    %122 = tpu.dynamic_rotate %121 by %c9_i32_94 dim 1 : vector<8x256xf32>, i32 -> vector<8x256xf32>
    %c0_95 = arith.constant 0 : index
    %c0_96 = arith.constant 0 : index
    %c0_97 = arith.constant 0 : index
    %123 = vector.load %arg2[%c0_95, %c0_96, %c0_97] : memref<12x8x256xf32, #tpu.memory_space<vmem>>, vector<1x8x256xf32>
    %124 = vector.shape_cast %123 : vector<1x8x256xf32> to vector<8x256xf32>
    %125 = arith.mulf %122, %124 : vector<8x256xf32>
    %c8_i32_98 = arith.constant 8 : i32
    %126 = tpu.dynamic_rotate %121 by %c8_i32_98 dim 1 : vector<8x256xf32>, i32 -> vector<8x256xf32>
    %c1_99 = arith.constant 1 : index
    %c0_100 = arith.constant 0 : index
    %c0_101 = arith.constant 0 : index
    %127 = vector.load %arg2[%c1_99, %c0_100, %c0_101] : memref<12x8x256xf32, #tpu.memory_space<vmem>>, vector<1x8x256xf32>
    %128 = vector.shape_cast %127 : vector<1x8x256xf32> to vector<8x256xf32>
    %129 = arith.mulf %126, %128 : vector<8x256xf32>
    %c7_i32_102 = arith.constant 7 : i32
    %130 = tpu.dynamic_rotate %121 by %c7_i32_102 dim 1 : vector<8x256xf32>, i32 -> vector<8x256xf32>
    %c2_103 = arith.constant 2 : index
    %c0_104 = arith.constant 0 : index
    %c0_105 = arith.constant 0 : index
    %131 = vector.load %arg2[%c2_103, %c0_104, %c0_105] : memref<12x8x256xf32, #tpu.memory_space<vmem>>, vector<1x8x256xf32>
    %132 = vector.shape_cast %131 : vector<1x8x256xf32> to vector<8x256xf32>
    %133 = arith.mulf %130, %132 : vector<8x256xf32>
    %c1_i32_106 = arith.constant 1 : i32
    %134 = tpu.dynamic_rotate %121 by %c1_i32_106 dim 1 : vector<8x256xf32>, i32 -> vector<8x256xf32>
    %c3_107 = arith.constant 3 : index
    %c0_108 = arith.constant 0 : index
    %c0_109 = arith.constant 0 : index
    %135 = vector.load %arg2[%c3_107, %c0_108, %c0_109] : memref<12x8x256xf32, #tpu.memory_space<vmem>>, vector<1x8x256xf32>
    %136 = vector.shape_cast %135 : vector<1x8x256xf32> to vector<8x256xf32>
    %137 = arith.mulf %134, %136 : vector<8x256xf32>
    %c255_i32_110 = arith.constant 255 : i32
    %138 = tpu.dynamic_rotate %121 by %c255_i32_110 dim 1 : vector<8x256xf32>, i32 -> vector<8x256xf32>
    %c5_111 = arith.constant 5 : index
    %c0_112 = arith.constant 0 : index
    %c0_113 = arith.constant 0 : index
    %139 = vector.load %arg2[%c5_111, %c0_112, %c0_113] : memref<12x8x256xf32, #tpu.memory_space<vmem>>, vector<1x8x256xf32>
    %140 = vector.shape_cast %139 : vector<1x8x256xf32> to vector<8x256xf32>
    %141 = arith.mulf %138, %140 : vector<8x256xf32>
    %c249_i32_114 = arith.constant 249 : i32
    %142 = tpu.dynamic_rotate %121 by %c249_i32_114 dim 1 : vector<8x256xf32>, i32 -> vector<8x256xf32>
    %c6_115 = arith.constant 6 : index
    %c0_116 = arith.constant 0 : index
    %c0_117 = arith.constant 0 : index
    %143 = vector.load %arg2[%c6_115, %c0_116, %c0_117] : memref<12x8x256xf32, #tpu.memory_space<vmem>>, vector<1x8x256xf32>
    %144 = vector.shape_cast %143 : vector<1x8x256xf32> to vector<8x256xf32>
    %145 = arith.mulf %142, %144 : vector<8x256xf32>
    %c248_i32_118 = arith.constant 248 : i32
    %146 = tpu.dynamic_rotate %121 by %c248_i32_118 dim 1 : vector<8x256xf32>, i32 -> vector<8x256xf32>
    %c7_119 = arith.constant 7 : index
    %c0_120 = arith.constant 0 : index
    %c0_121 = arith.constant 0 : index
    %147 = vector.load %arg2[%c7_119, %c0_120, %c0_121] : memref<12x8x256xf32, #tpu.memory_space<vmem>>, vector<1x8x256xf32>
    %148 = vector.shape_cast %147 : vector<1x8x256xf32> to vector<8x256xf32>
    %149 = arith.mulf %146, %148 : vector<8x256xf32>
    %c247_i32_122 = arith.constant 247 : i32
    %150 = tpu.dynamic_rotate %121 by %c247_i32_122 dim 1 : vector<8x256xf32>, i32 -> vector<8x256xf32>
    %c8_123 = arith.constant 8 : index
    %c0_124 = arith.constant 0 : index
    %c0_125 = arith.constant 0 : index
    %151 = vector.load %arg2[%c8_123, %c0_124, %c0_125] : memref<12x8x256xf32, #tpu.memory_space<vmem>>, vector<1x8x256xf32>
    %152 = vector.shape_cast %151 : vector<1x8x256xf32> to vector<8x256xf32>
    %153 = arith.mulf %150, %152 : vector<8x256xf32>
    %154 = tpu.concatenate %125, %129, %133, %137, %121, %141, %145, %149, %153 in 0 : vector<8x256xf32>, vector<8x256xf32>, vector<8x256xf32>, vector<8x256xf32>, vector<8x256xf32>, vector<8x256xf32>, vector<8x256xf32>, vector<8x256xf32>, vector<8x256xf32> -> vector<72x256xf32>
    %c2_126 = arith.constant 2 : index
    %c0_127 = arith.constant 0 : index
    %c0_128 = arith.constant 0 : index
    %155 = vector.load %arg3[%c2_126, %c0_127, %c0_128] : memref<3x8x72xf32, #tpu.memory_space<vmem>>, vector<1x8x72xf32>
    %156 = vector.shape_cast %155 : vector<1x8x72xf32> to vector<8x72xf32>
    %cst_129 = arith.constant dense<0.000000e+00> : vector<8x256xf32>
    %157 = tpu.matmul %156, %154, %cst_129 {dimension_numbers = #tpu.dot_dimension_numbers<[1], [0], [0], [1], [0, 0, 1, 1], [], []>} : vector<8x72xf32>, vector<72x256xf32>, vector<8x256xf32> -> vector<8x256xf32>
    %c2_130 = arith.constant 2 : index
    %c0_131 = arith.constant 0 : index
    %c0_132 = arith.constant 0 : index
    %158 = vector.load %arg5[%c2_130, %c0_131, %c0_132] : memref<3x8x1xf32, #tpu.memory_space<vmem>>, vector<1x8x1xf32>
    %159 = vector.shape_cast %158 : vector<1x8x1xf32> to vector<8x1xf32>
    %160 = vector.broadcast %159 : vector<8x1xf32> to vector<8x256xf32>
    %161 = arith.addf %157, %160 : vector<8x256xf32>
    %cst_133 = arith.constant 0.000000e+00 : f32
    %162 = vector.broadcast %cst_133 : f32 to vector<8x256xf32>
    %163 = arith.maximumf %161, %162 : vector<8x256xf32>
    %c64_i32_134 = arith.constant 64 : i32
    %164 = tpu.dynamic_rotate %163 by %c64_i32_134 dim 1 : vector<8x256xf32>, i32 -> vector<8x256xf32>
    %c9_135 = arith.constant 9 : index
    %c0_136 = arith.constant 0 : index
    %c0_137 = arith.constant 0 : index
    %165 = vector.load %arg2[%c9_135, %c0_136, %c0_137] : memref<12x8x256xf32, #tpu.memory_space<vmem>>, vector<1x8x256xf32>
    %166 = vector.shape_cast %165 : vector<1x8x256xf32> to vector<8x256xf32>
    %167 = arith.mulf %164, %166 : vector<8x256xf32>
    %c192_i32_138 = arith.constant 192 : i32
    %168 = tpu.dynamic_rotate %163 by %c192_i32_138 dim 1 : vector<8x256xf32>, i32 -> vector<8x256xf32>
    %c11_139 = arith.constant 11 : index
    %c0_140 = arith.constant 0 : index
    %c0_141 = arith.constant 0 : index
    %169 = vector.load %arg2[%c11_139, %c0_140, %c0_141] : memref<12x8x256xf32, #tpu.memory_space<vmem>>, vector<1x8x256xf32>
    %170 = vector.shape_cast %169 : vector<1x8x256xf32> to vector<8x256xf32>
    %171 = arith.mulf %168, %170 : vector<8x256xf32>
    %172 = tpu.concatenate %167, %163, %171 in 0 : vector<8x256xf32>, vector<8x256xf32>, vector<8x256xf32> -> vector<24x256xf32>
    %c2_142 = arith.constant 2 : index
    %c0_143 = arith.constant 0 : index
    %c0_144 = arith.constant 0 : index
    %173 = vector.load %arg4[%c2_142, %c0_143, %c0_144] : memref<3x8x24xf32, #tpu.memory_space<vmem>>, vector<1x8x24xf32>
    %174 = vector.shape_cast %173 : vector<1x8x24xf32> to vector<8x24xf32>
    %cst_145 = arith.constant dense<0.000000e+00> : vector<8x256xf32>
    %175 = tpu.matmul %174, %172, %cst_145 {dimension_numbers = #tpu.dot_dimension_numbers<[1], [0], [0], [1], [0, 0, 1, 1], [], []>} : vector<8x24xf32>, vector<24x256xf32>, vector<8x256xf32> -> vector<8x256xf32>
    %c2_146 = arith.constant 2 : index
    %c0_147 = arith.constant 0 : index
    %c0_148 = arith.constant 0 : index
    %176 = vector.load %arg6[%c2_146, %c0_147, %c0_148] : memref<3x8x1xf32, #tpu.memory_space<vmem>>, vector<1x8x1xf32>
    %177 = vector.shape_cast %176 : vector<1x8x1xf32> to vector<8x1xf32>
    %178 = vector.broadcast %177 : vector<8x1xf32> to vector<8x256xf32>
    %179 = arith.addf %175, %178 : vector<8x256xf32>
    %cst_149 = arith.constant 0.000000e+00 : f32
    %180 = vector.broadcast %cst_149 : f32 to vector<8x256xf32>
    %181 = arith.maximumf %179, %180 : vector<8x256xf32>
    %c0_150 = arith.constant 0 : index
    %c0_151 = arith.constant 0 : index
    %c0_152 = arith.constant 0 : index
    %182 = vector.load %arg7[%c0_150, %c0_151, %c0_152] : memref<1x8x256xf32, #tpu.memory_space<vmem>>, vector<1x8x256xf32>
    %183 = vector.shape_cast %182 : vector<1x8x256xf32> to vector<8x256xf32>
    %184 = vector.shape_cast %181 : vector<8x256xf32> to vector<1x8x256xf32>
    tpu.vector_store %arg7[%c0_150, %c0_151, %c0_152], %184 {strides = array<i32>} : memref<1x8x256xf32, #tpu.memory_space<vmem>>, vector<1x8x256xf32>,
    return
  }
  func.func @transform_0(%arg0: i32) -> (i32, i32, i32) {
    %c0_i32 = arith.constant 0 : i32
    %c0_i32_0 = arith.constant 0 : i32
    %c0_i32_1 = arith.constant 0 : i32
    return %arg0, %c0_i32, %c0_i32_0 : i32, i32, i32
  }
  func.func @transform_1(%arg0: i32) -> (i32, i32, i32) {
    %c0_i32 = arith.constant 0 : i32
    %c0_i32_0 = arith.constant 0 : i32
    %c0_i32_1 = arith.constant 0 : i32
    %c0_i32_2 = arith.constant 0 : i32
    return %c0_i32, %c0_i32_0, %c0_i32_1 : i32, i32, i32
  }
  func.func @transform_2(%arg0: i32) -> (i32, i32, i32) {
    %c0_i32 = arith.constant 0 : i32
    %c0_i32_0 = arith.constant 0 : i32
    %c0_i32_1 = arith.constant 0 : i32
    %c0_i32_2 = arith.constant 0 : i32
    return %c0_i32, %c0_i32_0, %c0_i32_1 : i32, i32, i32
  }
  func.func @transform_3(%arg0: i32) -> (i32, i32, i32) {
    %c0_i32 = arith.constant 0 : i32
    %c0_i32_0 = arith.constant 0 : i32
    %c0_i32_1 = arith.constant 0 : i32
    %c0_i32_2 = arith.constant 0 : i32
    return %c0_i32, %c0_i32_0, %c0_i32_1 : i32, i32, i32
  }
  func.func @transform_4(%arg0: i32) -> (i32, i32, i32) {
    %c0_i32 = arith.constant 0 : i32
    %c0_i32_0 = arith.constant 0 : i32
    %c0_i32_1 = arith.constant 0 : i32
    %c0_i32_2 = arith.constant 0 : i32
    return %c0_i32, %c0_i32_0, %c0_i32_1 : i32, i32, i32
  }
  func.func @transform_5(%arg0: i32) -> (i32, i32, i32) {
    %c0_i32 = arith.constant 0 : i32
    %c0_i32_0 = arith.constant 0 : i32
    %c0_i32_1 = arith.constant 0 : i32
    %c0_i32_2 = arith.constant 0 : i32
    return %c0_i32, %c0_i32_0, %c0_i32_1 : i32, i32, i32
  }
  func.func @transform_6(%arg0: i32) -> (i32, i32, i32) {
    %c0_i32 = arith.constant 0 : i32
    %c0_i32_0 = arith.constant 0 : i32
    %c0_i32_1 = arith.constant 0 : i32
    return %arg0, %c0_i32, %c0_i32_0 : i32, i32, i32
  }
}

</mosaic_0001>

<bundles_post_ra>
// kernel: stream_block_forward.1
= control target key start
LH: loop header
LB: loop body
LE: loop exit
PB: predicated region body
PF: predicated region fallthrough
CT: control target
= control target key end

     0   :  { %s1201_s21 = smov 0   ;;  %s1628_s0 = inlined_call_operand.vmem [shape: f32[2,8,256], index: 0, kind: input, shape index: {}]   ;;  %s1629_s1 = inlined_call_operand.vmem [shape: f32[12,8,256], index: 1, kind: input, shape index: {}]   ;;  %s1630_s2 = inlined_call_operand.vmem [shape: f32[3,8,72], index: 2, kind: input, shape index: {}]   ;;  %s1631_s3 = inlined_call_operand.vmem [shape: f32[3,8,24], index: 3, kind: input, shape index: {}]   ;;  %s1632_s4 = inlined_call_operand.vmem [shape: f32[3,8,1], index: 4, kind: input, shape index: {}]   ;;  %s1633_s5 = inlined_call_operand.vmem [shape: f32[3,8,1], index: 5, kind: input, shape index: {}]   ;;  %s1634_s6 = inlined_call_operand.vmem [shape: f32[2,8,256], index: 6, kind: output, shape index: {}]  }
   0x1 LB: > { %s1081_s22 = sadd.s32 4294967295, %s1153_s21   ;;  %p1085_p0 = scmp.ge.s32.totalorder %s1153_s21, 1  ;;  %s1153_s21 = sphi %s1201_s21, %s16_s21  }
   0x2   : > { %p212_p1 = scmp.lt.s32.totalorder %s1153_s21, 3 }
   0x4   : > { %p213_p2 = pnand %p1085_p0, %p212_p1 }
   0x5   : > { %p242_p3 = scmp.lt.s32.totalorder (!%p213_p2), %s1081_s22, 1  ;;  %s1155_s27 = smov (!%p213_p2), 120  }
   0x6   : > { %216 = sbr.rel (%p213_p2) target bundleno = 2028 (0x7ec), region = 44  ;;  %s1156_s28 = smov (!%p213_p2), 119  }
   0x7   : > { %s1157_s29 = smov (!%p213_p2), 121   ;;  %s1158_s30 = smov (!%p213_p2), 127  }
   0x8   : > { %s1159_s7 = smov (!%p213_p2), 1   ;;  %s1161_s8 = smov (!%p213_p2), 7  }
   0x9   : > { %s1163_s9 = smov (!%p213_p2), 8   ;;  %s1164_s10 = smov (!%p213_p2), 9  }
   0xb   : > { %s1636_s22 = smov (!%p242_p3, %s1081_s22), 1  ;;  %v1160_v2 = vmov 0.0   ;;  %v1162_v3 = vmov 0   ;;  %v352_v4 = vld [vmem:[%s1632_s4] sm:$0xff]  ;;  %v258_v6 = vlaneseq  ;;  %v1268_v10 = vld [vmem:[%s1629_s1 + $0x88] sm:$0xff]  ;;  %v1278_v14 = vld [vmem:[%s1629_s1 + $0x78] sm:$0xff] }
   0xc   : > { %s1124_s23 = sshll.u32 %s1636_s22, 4  ;;  %426 = vmatprep.mubr.f32.mxu0 %v1160_v2  ;;  %527 = vmatprep.mubr.f32.mxu1 %v1160_v2  ;;  %v453_v5 = vld [vmem:[%s1633_s5] sm:$0xff]  ;;  %v1289_v18 = vld [vmem:[%s1629_s1 + $0x70] sm:$0xff]  ;;  %v1304_v23 = vld [vmem:[%s1629_s1 + $0x68] sm:$0xff]  ;;  %vm358_vm8 = vcmask 588800   ;;  %vm459_vm10 = vcmask 195584  }
   0xd   : > { %s246_s26 = scalar_lea.vmem %s1628_s0, %s1124_s23  ;;  %1145 = vset.pattern.permute.xlu0 %v1162_v3  ;;  %1146 = vset.pattern.permute.xlu1 %v1162_v3  ;;  %v1261_v7 = vand.u32 127, %v258_v6  ;;  %v1273_v11 = vld [vmem:[%s1629_s1 + $0x80] sm:$0xff]  ;;  %v1318_v32 = vld [vmem:[%s1629_s1 + $0x50] sm:$0xff]  ;;  %v1323_v33 = vld [vmem:[%s1629_s1 + $0x58] sm:$0xff]  ;;  %s251_s18 = scalar_lea.vmem %s1634_s6, %s1124_s23 }
   0xe   : > { %v1217_v0 = vld [vmem:[%s246_s26] sm:$0xff]  ;;  %v1223_v1 = vld [vmem:[%s246_s26 + $0x8] sm:$0xff]  ;;  %v1335_v40 = vld [vmem:[%s1629_s1 + $0x30] sm:$0xff]  ;;  %s1165_s26 = smov 64  }
   0xf   : > { %327 = vrot.lane.b32.xlu1 %v1217_v0, %s1155_s27  ;;  %339 = vrot.lane.b32.xlu0 %v1217_v0, %s1156_s28  ;;  %vm331_vm0 = vcmp.lt.s32.totalorder %v1261_v7, 120  ;;  %vm343_vm1 = vcmp.lt.s32.totalorder %v1261_v7, 119  ;;  %vm319_vm2 = vcmp.lt.s32.totalorder %v1261_v7, 121  ;;  %v1299_v22 = vld [vmem:[%s1629_s1 + $0x60] sm:$0xff]  ;;  %vm307_vm3 = vcmp.lt.s32.totalorder %v1261_v7, 127  ;;  %v1340_v41 = vld [vmem:[%s1629_s1 + $0x38] sm:$0xff] }
  0x10   : > { %vm295_vm4 = vcmp.lt.s32.totalorder %v1261_v7, 1  ;;  %vm283_vm5 = vcmp.lt.s32.totalorder %v1261_v7, 7  ;;  %v1354_v48 = vld [vmem:[%s1629_s1 + $0x20] sm:$0xff]  ;;  %v1359_v49 = vld [vmem:[%s1629_s1 + $0x28] sm:$0xff]  ;;  %vm271_vm6 = vcmp.lt.s32.totalorder %v1261_v7, 8  ;;  %v1371_v56 = vld [vmem:[%s1629_s1 + $0x10] sm:$0xff] }
  0x11   : > { %v1376_v57 = vld [vmem:[%s1629_s1 + $0x18] sm:$0xff]  ;;  %vm260_vm7 = vcmp.lt.s32.totalorder %v1261_v7, 9  ;;  %vm439_vm9 = vcmp.lt.s32.totalorder %v1261_v7, 64 }
  0x13   : > { %329 = vrot.lane.b32.xlu1 %v1223_v1, %s1155_s27  ;;  %341 = vrot.lane.b32.xlu0 %v1223_v1, %s1156_s28 }
  0x17   : > { %317 = vrot.lane.b32.xlu1 %v1223_v1, %s1157_s29  ;;  %315 = vrot.lane.b32.xlu0 %v1217_v0, %s1157_s29 }
  0x1b   : > { %305 = vrot.lane.b32.xlu1 %v1223_v1, %s1158_s30  ;;  %303 = vrot.lane.b32.xlu0 %v1217_v0, %s1158_s30 }
  0x1f   : > { %293 = vrot.lane.b32.xlu1 %v1223_v1, %s1159_s7  ;;  %291 = vrot.lane.b32.xlu0 %v1217_v0, %s1159_s7 }
  0x23   : > { %281 = vrot.lane.b32.xlu1 %v1223_v1, %s1161_s8  ;;  %279 = vrot.lane.b32.xlu0 %v1217_v0, %s1161_s8 }
  0x27   : > { %269 = vrot.lane.b32.xlu1 %v1223_v1, %s1163_s9  ;;  %267 = vrot.lane.b32.xlu0 %v1217_v0, %s1163_s9 }
  0x2b   : > { %256 = vrot.lane.b32.xlu1 %v1223_v1, %s1164_s10  ;;  %254 = vrot.lane.b32.xlu0 %v1217_v0, %s1164_s10 }
  0x2f   : > { %355 = vperm.xlu0 %1145, %v352_v4  }
  0x33   : > { %456 = vperm.xlu0 %1145, %v453_v5  }
  0x81   : > { %v328_v8 = vpop.permute.xlu1 %327  ;;  %v340_v9 = vpop.permute.xlu0 %339 }
  0x85   : > { %v330_v12 = vpop.permute.xlu1 %329  ;;  %v342_v13 = vpop.permute.xlu0 %341 }
  0x86   : > { %v333_v15 = vsel %vm331_vm0, %v330_v12, %v328_v8  ;;  %v344_v16 = vsel %vm343_vm1, %v340_v9, %v342_v13  ;;  %v345_v17 = vsel %vm343_vm1, %v342_v13, %v340_v9  ;;  %v332_v19 = vsel %vm331_vm0, %v328_v8, %v330_v12  ;;  %v351_v12 = vld [vmem:[%s1630_s2] sm:$0xff] }
  0x87   : > { %v350_v20 = vmul.f32 %v1268_v10, %v345_v17  ;;  %v349_v21 = vmul.f32 %v1273_v11, %v344_v16  ;;  %v338_v24 = vmul.f32 %v1278_v14, %v333_v15  ;;  %v337_v27 = vmul.f32 %v1289_v18, %v332_v19 }
  0x89   : > { %v318_v25 = vpop.permute.xlu1 %317  ;;  %376 = vmatprep.subr.mxu0 %v350_v20  ;;  %v316_v26 = vpop.permute.xlu0 %315 }
  0x8a   : > { %v320_v28 = vsel %vm319_vm2, %v316_v26, %v318_v25  ;;  %v321_v29 = vsel %vm319_vm2, %v318_v25, %v316_v26  ;;  %377 = vmatpush1.msra.mxu0 %v349_v21  ;;  %v1412_v25 = vld [vmem:[%s1629_s1 + $0xb8] sm:$0xff]  ;;  %v1417_v26 = vld [vmem:[%s1629_s1 + $0xb0] sm:$0xff] }
  0x8b   : > { %v325_v30 = vmul.f32 %v1299_v22, %v320_v28  ;;  %v326_v31 = vmul.f32 %v1304_v23, %v321_v29  ;;  %378 = vmatprep.subr.mxu0 %v338_v24 }
  0x8c   : > { %379 = vmatpush1.msra.mxu0 %v337_v27 }
  0x8d   : > { %v306_v34 = vpop.permute.xlu1 %305  ;;  %380 = vmatprep.subr.mxu0 %v326_v31  ;;  %v304_v35 = vpop.permute.xlu0 %303 }
  0x8e   : > { %v308_v36 = vsel %vm307_vm3, %v304_v35, %v306_v34  ;;  %v309_v37 = vsel %vm307_vm3, %v306_v34, %v304_v35  ;;  %381 = vmatpush1.msra.mxu0 %v325_v30  ;;  %v1428_v34 = vld [vmem:[%s1629_s1 + $0x98] sm:$0xff]  ;;  %v1433_v35 = vld [vmem:[%s1629_s1 + $0x90] sm:$0xff] }
  0x8f   : > { %v313_v38 = vmul.f32 %v1318_v32, %v308_v36  ;;  %v314_v39 = vmul.f32 %v1323_v33, %v309_v37 }
  0x91   : > { %v294_v42 = vpop.permute.xlu1 %293  ;;  %382 = vmatprep.subr.mxu0 %v314_v39  ;;  %v292_v43 = vpop.permute.xlu0 %291 }
  0x92   : > { %v296_v44 = vsel %vm295_vm4, %v292_v43, %v294_v42  ;;  %v297_v45 = vsel %vm295_vm4, %v294_v42, %v292_v43  ;;  %383 = vmatpush1.msra.mxu0 %v313_v38  ;;  %v452_v38 = vld [vmem:[%s1631_s3] sm:$0xff] }
  0x93   : > { %v301_v46 = vmul.f32 %v1335_v40, %v297_v45  ;;  %v302_v47 = vmul.f32 %v1340_v41, %v296_v44  ;;  %384 = vmatprep.subr.mxu0 %v1223_v1  ;;  %v1393_v1 = vld [vmem:[%s1629_s1 + $0x8] sm:$0xff] }
  0x94   : > { %385 = vmatpush1.msra.mxu0 %v1217_v0  ;;  %v1388_v0 = vld [vmem:[%s1629_s1] sm:$0xff] }
  0x95   : > { %v282_v50 = vpop.permute.xlu1 %281  ;;  %386 = vmatprep.subr.mxu0 %v302_v47  ;;  %v280_v51 = vpop.permute.xlu0 %279 }
  0x96   : > { %v284_v52 = vsel %vm283_vm5, %v280_v51, %v282_v50  ;;  %v285_v53 = vsel %vm283_vm5, %v282_v50, %v280_v51  ;;  %387 = vmatpush1.msra.mxu0 %v301_v46  ;;  %v1111_v50 = vld [vmem:[%s1632_s4 + $0x8] sm:$0xff] }
  0x97   : > { %v289_v54 = vmul.f32 %v1354_v48, %v285_v53  ;;  %v290_v55 = vmul.f32 %v1359_v49, %v284_v52 }
  0x99   : > { %v270_v58 = vpop.permute.xlu1 %269  ;;  %388 = vmatprep.subr.mxu0 %v290_v55  ;;  %v268_v59 = vpop.permute.xlu0 %267 }
  0x9a   : > { %v272_v60 = vsel %vm271_vm6, %v268_v59, %v270_v58  ;;  %v273_v61 = vsel %vm271_vm6, %v270_v58, %v268_v59  ;;  %389 = vmatpush1.msra.mxu0 %v289_v54 }
  0x9b   : > { %v277_v62 = vmul.f32 %v1371_v56, %v273_v61  ;;  %v278_v63 = vmul.f32 %v1376_v57, %v272_v60 }
  0x9d   : > { %v257_v3 = vpop.permute.xlu1 %256  ;;  %390 = vmatprep.subr.mxu0 %v278_v63  ;;  %v255_v4 = vpop.permute.xlu0 %254 }
  0x9e   : > { %v261_v5 = vsel %vm260_vm7, %v255_v4, %v257_v3  ;;  %v262_v6 = vsel %vm260_vm7, %v257_v3, %v255_v4  ;;  %391 = vmatpush1.msra.mxu0 %v277_v62 }
  0x9f   : > { %v265_v8 = vmul.f32 %v1388_v0, %v262_v6  ;;  %v266_v9 = vmul.f32 %v1393_v1, %v261_v5 }
  0xa1   : > { %392 = vmatprep.subr.mxu0 %v266_v9 }
  0xa2   : > { %393 = vmatpush1.msra.mxu0 %v265_v8 }
  0xa3   : > { %1104 = vmatmul.mubr.msk.f32.vlgmr.msra.gmra.mxu0 %vm358_vm8, %v351_v12 }
  0xa4   : > { %920 = vmatprep.mubr.f32.mxu0 %v1160_v2 }
  0xaa   : > { %v356_v13 = vpop.permute.xlu0 %355 }
  0xae   : > { %v457_v39 = vpop.permute.xlu0 %456 }
 0x163   : > { %v428_v15 = vpop.f32.mrf.mxu0 }
 0x164   : > { %v429_v16 = vadd.f32 %v428_v15, %v356_v13 }
 0x165   : > { %v430_v17 = vpop.f32.mrf.mxu0 }
 0x166   : > { %v433_v19 = vmax.f32 %v429_v16, 0.0  ;;  %v431_v20 = vadd.f32 %v430_v17, %v356_v13 }
 0x168   : > { %435 = vrot.lane.b32.xlu1 %v433_v19, %s1165_s26  ;;  %v434_v21 = vmax.f32 %v431_v20, 0.0 }
 0x16c   : > { %437 = vrot.lane.b32.xlu1 %v434_v21, %s1165_s26 }
 0x1da   : > { %v436_v24 = vpop.permute.xlu1 %435 }
 0x1de   : > { %v438_v27 = vpop.permute.xlu1 %437 }
 0x1df   : > { %v440_v28 = vsel %vm439_vm9, %v436_v24, %v438_v27  ;;  %v441_v29 = vsel %vm439_vm9, %v438_v27, %v436_v24 }
 0x1e0   : > { %v451_v30 = vmul.f32 %v1412_v25, %v441_v29  ;;  %v450_v31 = vmul.f32 %v1417_v26, %v440_v28  ;;  %v446_v36 = vmul.f32 %v1428_v34, %v440_v28  ;;  %v445_v37 = vmul.f32 %v1433_v35, %v441_v29 }
 0x1e2   : > { %489 = vmatprep.subr.mxu1 %v451_v30 }
 0x1e3   : > { %490 = vmatpush1.msra.mxu1 %v450_v31 }
 0x1e4   : > { %491 = vmatprep.subr.mxu1 %v434_v21 }
 0x1e5   : > { %492 = vmatpush1.msra.mxu1 %v433_v19 }
 0x1e6   : > { %493 = vmatprep.subr.mxu1 %v446_v36 }
 0x1e7   : > { %494 = vmatpush1.msra.mxu1 %v445_v37 }
 0x1e8   : > { %1109 = vmatmul.mubr.msk.f32.vlgmr.msra.gmra.mxu1 %vm459_vm10, %v452_v38 }
 0x1e9   : > { %676 = vmatprep.mubr.f32.mxu1 %v1160_v2 }
 0x2a8   : > { %v529_v42 = vpop.f32.mrf.mxu1 }
 0x2a9   : > { %v530_v43 = vadd.f32 %v529_v42, %v457_v39 }
 0x2aa   : > { %v531_v44 = vpop.f32.mrf.mxu1 }
 0x2ab   : > { %v534_v45 = vmax.f32 %v530_v43, 0.0  ;;  %v532_v46 = vadd.f32 %v531_v44, %v457_v39 }
 0x2ad   : > { %v535_v47 = vmax.f32 %v532_v46, 0.0  ;;  %592 = vrot.lane.b32.xlu1 %v534_v45, %s1156_s28 }
 0x2af   : > { %594 = vrot.lane.b32.xlu0 %v535_v47, %s1156_s28 }
 0x2b1   : > { %584 = vrot.lane.b32.xlu1 %v534_v45, %s1155_s27 }
 0x2b3   : > { %586 = vrot.lane.b32.xlu0 %v535_v47, %s1155_s27 }
 0x2b5   : > { %576 = vrot.lane.b32.xlu1 %v534_v45, %s1157_s29 }
 0x2b7   : > { %578 = vrot.lane.b32.xlu0 %v535_v47, %s1157_s29 }
 0x2b9   : > { %568 = vrot.lane.b32.xlu1 %v534_v45, %s1158_s30 }
 0x2bb   : > { %570 = vrot.lane.b32.xlu0 %v535_v47, %s1158_s30 }
 0x2bd   : > { %560 = vrot.lane.b32.xlu1 %v534_v45, %s1159_s7 }
 0x2bf   : > { %562 = vrot.lane.b32.xlu0 %v535_v47, %s1159_s7 }
 0x2c1   : > { %552 = vrot.lane.b32.xlu1 %v534_v45, %s1161_s8 }
 0x2c3   : > { %554 = vrot.lane.b32.xlu0 %v535_v47, %s1161_s8 }
 0x2c5   : > { %544 = vrot.lane.b32.xlu1 %v534_v45, %s1163_s9 }
 0x2c7   : > { %546 = vrot.lane.b32.xlu0 %v535_v47, %s1163_s9 }
 0x2c9   : > { %536 = vrot.lane.b32.xlu1 %v534_v45, %s1164_s10 }
 0x2cb   : > { %538 = vrot.lane.b32.xlu0 %v535_v47, %s1164_s10 }
 0x2cd   : > { %606 = vperm.xlu1 %1146, %v1111_v50  }
 0x31f   : > { %v593_v51 = vpop.permute.xlu1 %592 }
 0x321   : > { %v595_v52 = vpop.permute.xlu0 %594 }
 0x322   : > { %v596_v53 = vsel %vm343_vm1, %v593_v51, %v595_v52  ;;  %v597_v54 = vsel %vm343_vm1, %v595_v52, %v593_v51 }
 0x323   : > { %v598_v55 = vmul.f32 %v1273_v11, %v596_v53  ;;  %v599_v58 = vmul.f32 %v1268_v10, %v597_v54  ;;  %v585_v59 = vpop.permute.xlu1 %584 }
 0x325   : > { %v587_v60 = vpop.permute.xlu0 %586  ;;  %626 = vmatprep.subr.mxu1 %v599_v58 }
 0x326   : > { %v588_v61 = vsel %vm331_vm0, %v585_v59, %v587_v60  ;;  %v589_v62 = vsel %vm331_vm0, %v587_v60, %v585_v59  ;;  %627 = vmatpush1.msra.mxu1 %v598_v55  ;;  %v1110_v59 = vld [vmem:[%s1630_s2 + $0x8] sm:$0xff] }
 0x327   : > { %v590_v63 = vmul.f32 %v1289_v18, %v588_v61  ;;  %v591_v3 = vmul.f32 %v1278_v14, %v589_v62  ;;  %v577_v4 = vpop.permute.xlu1 %576 }
 0x329   : > { %v579_v5 = vpop.permute.xlu0 %578  ;;  %628 = vmatprep.subr.mxu1 %v591_v3 }
 0x32a   : > { %v580_v6 = vsel %vm319_vm2, %v577_v4, %v579_v5  ;;  %v581_v8 = vsel %vm319_vm2, %v579_v5, %v577_v4  ;;  %629 = vmatpush1.msra.mxu1 %v590_v63 }
 0x32b   : > { %v582_v9 = vmul.f32 %v1299_v22, %v580_v6  ;;  %v583_v12 = vmul.f32 %v1304_v23, %v581_v8  ;;  %v569_v13 = vpop.permute.xlu1 %568  ;;  %v1114_v6 = vld [vmem:[%s1633_s5 + $0x8] sm:$0xff] }
 0x32d   : > { %v571_v15 = vpop.permute.xlu0 %570  ;;  %630 = vmatprep.subr.mxu1 %v583_v12 }
 0x32e   : > { %v572_v16 = vsel %vm307_vm3, %v569_v13, %v571_v15  ;;  %v573_v17 = vsel %vm307_vm3, %v571_v15, %v569_v13  ;;  %631 = vmatpush1.msra.mxu1 %v582_v9 }
 0x32f   : > { %v574_v19 = vmul.f32 %v1318_v32, %v572_v16  ;;  %v575_v20 = vmul.f32 %v1323_v33, %v573_v17  ;;  %v561_v21 = vpop.permute.xlu1 %560 }
 0x331   : > { %v563_v24 = vpop.permute.xlu0 %562  ;;  %632 = vmatprep.subr.mxu1 %v575_v20  ;;  %v1113_v20 = vld [vmem:[%s1631_s3 + $0x8] sm:$0xff] }
 0x332   : > { %v564_v27 = vsel %vm295_vm4, %v561_v21, %v563_v24  ;;  %v565_v28 = vsel %vm295_vm4, %v563_v24, %v561_v21  ;;  %633 = vmatpush1.msra.mxu1 %v574_v19 }
 0x333   : > { %v566_v29 = vmul.f32 %v1335_v40, %v565_v28  ;;  %v567_v30 = vmul.f32 %v1340_v41, %v564_v27  ;;  %634 = vmatprep.subr.mxu1 %v535_v47  ;;  %v553_v31 = vpop.permute.xlu1 %552 }
 0x334   : > { %635 = vmatpush1.msra.mxu1 %v534_v45 }
 0x335   : > { %v555_v36 = vpop.permute.xlu0 %554  ;;  %636 = vmatprep.subr.mxu1 %v567_v30 }
 0x336   : > { %v556_v37 = vsel %vm283_vm5, %v553_v31, %v555_v36  ;;  %v557_v38 = vsel %vm283_vm5, %v555_v36, %v553_v31  ;;  %637 = vmatpush1.msra.mxu1 %v566_v29 }
 0x337   : > { %v558_v39 = vmul.f32 %v1354_v48, %v557_v38  ;;  %v559_v42 = vmul.f32 %v1359_v49, %v556_v37  ;;  %v545_v43 = vpop.permute.xlu1 %544 }
 0x339   : > { %v547_v44 = vpop.permute.xlu0 %546  ;;  %638 = vmatprep.subr.mxu1 %v559_v42 }
 0x33a   : > { %v548_v46 = vsel %vm271_vm6, %v545_v43, %v547_v44  ;;  %v549_v45 = vsel %vm271_vm6, %v547_v44, %v545_v43  ;;  %639 = vmatpush1.msra.mxu1 %v558_v39 }
 0x33b   : > { %v550_v47 = vmul.f32 %v1371_v56, %v549_v45  ;;  %v551_v50 = vmul.f32 %v1376_v57, %v548_v46  ;;  %v537_v51 = vpop.permute.xlu1 %536 }
 0x33d   : > { %v539_v52 = vpop.permute.xlu0 %538  ;;  %640 = vmatprep.subr.mxu1 %v551_v50 }
 0x33e   : > { %v540_v53 = vsel %vm260_vm7, %v537_v51, %v539_v52  ;;  %v541_v54 = vsel %vm260_vm7, %v539_v52, %v537_v51  ;;  %641 = vmatpush1.msra.mxu1 %v550_v47 }
 0x33f   : > { %v542_v55 = vmul.f32 %v541_v54, %v1388_v0  ;;  %v543_v58 = vmul.f32 %v540_v53, %v1393_v1 }
 0x341   : > { %642 = vmatprep.subr.mxu1 %v543_v58 }
 0x342   : > { %643 = vmatpush1.msra.mxu1 %v542_v55 }
 0x343   : > { %1112 = vmatmul.mubr.msk.f32.vlgmr.msra.gmra.mxu1 %vm358_vm8, %v1110_v59 }
 0x344   : > { %771 = vmatprep.mubr.f32.mxu1 %v1160_v2 }
 0x348   : > { %v607_v60 = vpop.permute.xlu1 %606 }
 0x403   : > { %v678_v61 = vpop.f32.mrf.mxu1 }
 0x404   : > { %v679_v62 = vadd.f32 %v678_v61, %v607_v60 }
 0x405   : > { %v680_v63 = vpop.f32.mrf.mxu1 }
 0x406   : > { %v683_v3 = vmax.f32 %v679_v62, 0.0  ;;  %v681_v4 = vadd.f32 %v680_v63, %v607_v60 }
 0x408   : > { %v684_v5 = vmax.f32 %v681_v4, 0.0  ;;  %685 = vrot.lane.b32.xlu0 %v683_v3, %s1165_s26 }
 0x40a   : > { %687 = vrot.lane.b32.xlu1 %v684_v5, %s1165_s26 }
 0x40c   : > { %701 = vperm.xlu0 %1145, %v1114_v6  }
 0x47a   : > { %v686_v8 = vpop.permute.xlu0 %685 }
 0x47c   : > { %v688_v9 = vpop.permute.xlu1 %687 }
 0x47d   : > { %v689_v12 = vsel %vm439_vm9, %v686_v8, %v688_v9  ;;  %v690_v13 = vsel %vm439_vm9, %v688_v9, %v686_v8 }
 0x47e   : > { %v693_v15 = vmul.f32 %v1417_v26, %v689_v12  ;;  %v694_v16 = vmul.f32 %v1412_v25, %v690_v13  ;;  %v692_v17 = vmul.f32 %v1428_v34, %v689_v12  ;;  %v691_v19 = vmul.f32 %v1433_v35, %v690_v13 }
 0x480   : > { %733 = vmatprep.subr.mxu1 %v694_v16 }
 0x481   : > { %734 = vmatpush1.msra.mxu1 %v693_v15 }
 0x482   : > { %735 = vmatprep.subr.mxu1 %v684_v5 }
 0x483   : > { %736 = vmatpush1.msra.mxu1 %v683_v3 }
 0x484   : > { %737 = vmatprep.subr.mxu1 %v692_v17 }
 0x485   : > { %738 = vmatpush1.msra.mxu1 %v691_v19 }
 0x486   : > { %1115 = vmatmul.mubr.msk.f32.vlgmr.msra.gmra.mxu1 %vm459_vm10, %v1113_v20 }
 0x487   : > { %1015 = vmatprep.mubr.f32.mxu1 %v1160_v2  ;;  %v702_v21 = vpop.permute.xlu0 %701  ;;  %v1117_v2 = vld [vmem:[%s1632_s4 + $0x10] sm:$0xff] }
 0x546   : > { %v773_v24 = vpop.f32.mrf.mxu1 }
 0x547   : > { %v774_v27 = vadd.f32 %v773_v24, %v702_v21 }
 0x548   : > { %v775_v28 = vpop.f32.mrf.mxu1 }
 0x549   : > { %v778_v29 = vmax.f32 %v774_v27, 0.0  ;;  %v776_v30 = vadd.f32 %v775_v28, %v702_v21 }
 0x54b   : > { %v779_v31 = vmax.f32 %v776_v30, 0.0  ;;  %836 = vrot.lane.b32.xlu1 %v778_v29, %s1156_s28 }
 0x54d   : > { %838 = vrot.lane.b32.xlu0 %v779_v31, %s1156_s28 }
 0x54f   : > { %828 = vrot.lane.b32.xlu1 %v778_v29, %s1155_s27 }
 0x551   : > { %830 = vrot.lane.b32.xlu0 %v779_v31, %s1155_s27 }
 0x553   : > { %820 = vrot.lane.b32.xlu1 %v778_v29, %s1157_s29 }
 0x555   : > { %822 = vrot.lane.b32.xlu0 %v779_v31, %s1157_s29 }
 0x557   : > { %812 = vrot.lane.b32.xlu1 %v778_v29, %s1158_s30 }
 0x559   : > { %814 = vrot.lane.b32.xlu0 %v779_v31, %s1158_s30 }
 0x55b   : > { %804 = vrot.lane.b32.xlu1 %v778_v29, %s1159_s7 }
 0x55d   : > { %806 = vrot.lane.b32.xlu0 %v779_v31, %s1159_s7 }
 0x55f   : > { %796 = vrot.lane.b32.xlu1 %v778_v29, %s1161_s8 }
 0x561   : > { %798 = vrot.lane.b32.xlu0 %v779_v31, %s1161_s8 }
 0x563   : > { %788 = vrot.lane.b32.xlu1 %v778_v29, %s1163_s9 }
 0x565   : > { %790 = vrot.lane.b32.xlu0 %v779_v31, %s1163_s9 }
 0x567   : > { %780 = vrot.lane.b32.xlu1 %v778_v29, %s1164_s10 }
 0x569   : > { %782 = vrot.lane.b32.xlu0 %v779_v31, %s1164_s10 }
 0x56b   : > { %850 = vperm.xlu1 %1146, %v1117_v2  }
 0x5bd   : > { %v837_v36 = vpop.permute.xlu1 %836 }
 0x5bf   : > { %v839_v37 = vpop.permute.xlu0 %838 }
 0x5c0   : > { %v840_v38 = vsel %vm343_vm1, %v837_v36, %v839_v37  ;;  %v841_v39 = vsel %vm343_vm1, %v839_v37, %v837_v36 }
 0x5c1   : > { %v842_v42 = vmul.f32 %v1273_v11, %v840_v38  ;;  %v843_v43 = vmul.f32 %v1268_v10, %v841_v39  ;;  %v829_v44 = vpop.permute.xlu1 %828 }
 0x5c3   : > { %v831_v46 = vpop.permute.xlu0 %830  ;;  %870 = vmatprep.subr.mxu0 %v843_v43 }
 0x5c4   : > { %v832_v45 = vsel %vm331_vm0, %v829_v44, %v831_v46  ;;  %v833_v47 = vsel %vm331_vm0, %v831_v46, %v829_v44  ;;  %871 = vmatpush1.msra.mxu0 %v842_v42  ;;  %v1119_v44 = vld [vmem:[%s1631_s3 + $0x10] sm:$0xff] }
 0x5c5   : > { %v834_v50 = vmul.f32 %v1289_v18, %v832_v45  ;;  %v835_v51 = vmul.f32 %v1278_v14, %v833_v47  ;;  %v821_v52 = vpop.permute.xlu1 %820 }
 0x5c7   : > { %v823_v53 = vpop.permute.xlu0 %822  ;;  %872 = vmatprep.subr.mxu0 %v835_v51 }
 0x5c8   : > { %v824_v10 = vsel %vm319_vm2, %v821_v52, %v823_v53  ;;  %v825_v11 = vsel %vm319_vm2, %v823_v53, %v821_v52  ;;  %873 = vmatpush1.msra.mxu0 %v834_v50 }
 0x5c9   : > { %v826_v54 = vmul.f32 %v1299_v22, %v824_v10  ;;  %v827_v55 = vmul.f32 %v1304_v23, %v825_v11  ;;  %v813_v58 = vpop.permute.xlu1 %812 }
 0x5cb   : > { %v815_v59 = vpop.permute.xlu0 %814  ;;  %874 = vmatprep.subr.mxu0 %v827_v55 }
 0x5cc   : > { %v816_v14 = vsel %vm307_vm3, %v813_v58, %v815_v59  ;;  %v817_v18 = vsel %vm307_vm3, %v815_v59, %v813_v58  ;;  %875 = vmatpush1.msra.mxu0 %v826_v54 }
 0x5cd   : > { %v818_v60 = vmul.f32 %v1318_v32, %v816_v14  ;;  %v819_v61 = vmul.f32 %v1323_v33, %v817_v18  ;;  %v805_v62 = vpop.permute.xlu1 %804 }
 0x5cf   : > { %v807_v63 = vpop.permute.xlu0 %806  ;;  %876 = vmatprep.subr.mxu0 %v819_v61 }
 0x5d0   : > { %v808_v22 = vsel %vm295_vm4, %v805_v62, %v807_v63  ;;  %v809_v23 = vsel %vm295_vm4, %v807_v63, %v805_v62  ;;  %877 = vmatpush1.msra.mxu0 %v818_v60 }
 0x5d1   : > { %v810_v3 = vmul.f32 %v1335_v40, %v809_v23  ;;  %v811_v4 = vmul.f32 %v1340_v41, %v808_v22  ;;  %878 = vmatprep.subr.mxu0 %v779_v31  ;;  %v797_v5 = vpop.permute.xlu1 %796 }
 0x5d2   : > { %879 = vmatpush1.msra.mxu0 %v778_v29 }
 0x5d3   : > { %v799_v32 = vpop.permute.xlu0 %798  ;;  %880 = vmatprep.subr.mxu0 %v811_v4 }
 0x5d4   : > { %v800_v33 = vsel %vm283_vm5, %v797_v5, %v799_v32  ;;  %v801_v6 = vsel %vm283_vm5, %v799_v32, %v797_v5  ;;  %881 = vmatpush1.msra.mxu0 %v810_v3 }
 0x5d5   : > { %v802_v8 = vmul.f32 %v1354_v48, %v801_v6  ;;  %v803_v9 = vmul.f32 %v1359_v49, %v800_v33  ;;  %v789_v12 = vpop.permute.xlu1 %788 }
 0x5d7   : > { %v791_v40 = vpop.permute.xlu0 %790  ;;  %882 = vmatprep.subr.mxu0 %v803_v9 }
 0x5d8   : > { %v792_v41 = vsel %vm271_vm6, %v789_v12, %v791_v40  ;;  %v793_v13 = vsel %vm271_vm6, %v791_v40, %v789_v12  ;;  %883 = vmatpush1.msra.mxu0 %v802_v8 }
 0x5d9   : > { %v794_v15 = vmul.f32 %v1371_v56, %v793_v13  ;;  %v795_v16 = vmul.f32 %v1376_v57, %v792_v41  ;;  %v781_v17 = vpop.permute.xlu1 %780  ;;  %v1116_v56 = vld [vmem:[%s1630_s2 + $0x10] sm:$0xff] }
 0x5db   : > { %v783_v19 = vpop.permute.xlu0 %782  ;;  %884 = vmatprep.subr.mxu0 %v795_v16 }
 0x5dc   : > { %v784_v48 = vsel %vm260_vm7, %v781_v17, %v783_v19  ;;  %v785_v49 = vsel %vm260_vm7, %v783_v19, %v781_v17  ;;  %885 = vmatpush1.msra.mxu0 %v794_v15 }
 0x5dd   : > { %v786_v20 = vmul.f32 %v785_v49, %v1388_v0  ;;  %v787_v21 = vmul.f32 %v784_v48, %v1393_v1  ;;  %v1120_v0 = vld [vmem:[%s1633_s5 + $0x10] sm:$0xff] }
 0x5df   : > { %886 = vmatprep.subr.mxu0 %v787_v21 }
 0x5e0   : > { %887 = vmatpush1.msra.mxu0 %v786_v20 }
 0x5e1   : > { %1118 = vmatmul.mubr.msk.f32.vlgmr.msra.gmra.mxu0 %vm358_vm8, %v1116_v56 }
 0x5e6   : > { %v851_v57 = vpop.permute.xlu1 %850 }
 0x6a1   : > { %v922_v24 = vpop.f32.mrf.mxu0 }
 0x6a2   : > { %v923_v27 = vadd.f32 %v922_v24, %v851_v57 }
 0x6a3   : > { %v924_v28 = vpop.f32.mrf.mxu0 }
 0x6a4   : > { %v927_v29 = vmax.f32 %v923_v27, 0.0  ;;  %v925_v30 = vadd.f32 %v924_v28, %v851_v57 }
 0x6a6   : > { %v928_v31 = vmax.f32 %v925_v30, 0.0  ;;  %929 = vrot.lane.b32.xlu0 %v927_v29, %s1165_s26 }
 0x6a8   : > { %931 = vrot.lane.b32.xlu1 %v928_v31, %s1165_s26 }
 0x6aa   : > { %945 = vperm.xlu0 %1145, %v1120_v0  }
 0x718   : > { %v930_v1 = vpop.permute.xlu0 %929 }
 0x71a   : > { %v932_v2 = vpop.permute.xlu1 %931 }
 0x71b   : > { %v933_v36 = vsel %vm439_vm9, %v930_v1, %v932_v2  ;;  %v934_v37 = vsel %vm439_vm9, %v932_v2, %v930_v1 }
 0x71c   : > { %v937_v38 = vmul.f32 %v1417_v26, %v933_v36  ;;  %v938_v39 = vmul.f32 %v1412_v25, %v934_v37  ;;  %v936_v42 = vmul.f32 %v1428_v34, %v933_v36  ;;  %v935_v43 = vmul.f32 %v1433_v35, %v934_v37 }
 0x71e   : > { %977 = vmatprep.subr.mxu1 %v938_v39 }
 0x71f   : > { %978 = vmatpush1.msra.mxu1 %v937_v38 }
 0x720   : > { %979 = vmatprep.subr.mxu1 %v928_v31 }
 0x721   : > { %980 = vmatpush1.msra.mxu1 %v927_v29 }
 0x722   : > { %981 = vmatprep.subr.mxu1 %v936_v42 }
 0x723   : > { %982 = vmatpush1.msra.mxu1 %v935_v43 }
 0x724   : > { %1121 = vmatmul.mubr.msk.f32.vlgmr.msra.gmra.mxu1 %vm459_vm10, %v1119_v44 }
 0x725   : > { %v946_v7 = vpop.permute.xlu0 %945 }
 0x7e4   : > { %v1017_v26 = vpop.f32.mrf.mxu1 }
 0x7e5   : > { %v1018_v46 = vadd.f32 %v1017_v26, %v946_v7 }
 0x7e6   : > { %v1019_v25 = vpop.f32.mrf.mxu1 }
 0x7e7   : > { %v1022_v34 = vmax.f32 %v1018_v46, 0.0  ;;  %v1020_v35 = vadd.f32 %v1019_v25, %v946_v7 }
 0x7e9   : > { %1024 = vst [vmem:[%s251_s18] sm:$0xff] %v1022_v34  ;;  %v1023_v45 = vmax.f32 %v1020_v35, 0.0 }
 0x7eb   : > { %1025 = vst [vmem:[%s251_s18 + $0x8] sm:$0xff] %v1023_v45 }
 0x7ec PF: > { %s16_s21 = sadd.s32 1, %s1153_s21  }
 0x7ed   : > { %p13_p4 = scmp.ge.s32.totalorder %s16_s21, 4  }
 0x7ef   :  { %15 = sbr.rel (!%p13_p4) target bundleno = 1 (0x1), region = 91 }

</bundles_post_ra>
